<compile_context>
chip_gen: v7x
topology: tpu7x:2x2x1
jax: 0.10.0
libtpu: 0.0.40
codegen_flags: <defaults>
</compile_context>

<pallas_src>
from functools import partial

import jax
import jax.numpy as jnp
from jax import lax
from jax.experimental import pallas as pl
from jax.experimental.pallas import tpu as pltpu


def _round_up(x: int, m: int) -> int:
    return ((x + m - 1) // m) * m


def perceptron_kernel(x_ref, w_ref, b_ref, *rest, p, apply_dropout):
    # Ref layout: (x, w, b, [rand], out, acc_scratch)
    if apply_dropout:
        r_ref, o_ref, acc_ref = rest
    else:
        r_ref = None
        o_ref, acc_ref = rest

    k = pl.program_id(2)

    @pl.when(k == 0)
    def _init():
        acc_ref[...] = jnp.zeros_like(acc_ref)

    # (tm, tk) x (tn, tk) contracting on the K axis -> (tm, tn) on the MXU.
    # Weight stays in PyTorch (c_out, c_in) layout: no wrapper-side transpose.
    acc_ref[...] += lax.dot_general(
        x_ref[...], w_ref[...],
        dimension_numbers=(((1,), (1,)), ((), ())),
        preferred_element_type=jnp.float32)

    @pl.when(k == pl.num_programs(2) - 1)
    def _finalize():
        z = acc_ref[...] + b_ref[...]  # (1, tn) bias lane-broadcasts over rows
        if apply_dropout:
            # Integer-domain threshold: keep iff bits >= p * 2^32
            # (keep prob = 1 - p), fused with ReLU into a single select.
            thresh = jnp.uint32(min(int(round(p * (2.0 ** 32))), 2 ** 32 - 1))
            keep = r_ref[...] >= thresh
            inv_keep = 1.0 / (1.0 - p)
            z = jnp.where(jnp.logical_and(keep, z > 0.0), z * inv_keep, 0.0)
        else:
            z = jnp.maximum(z, 0.0)
        o_ref[...] = z.astype(o_ref.dtype)


def perceptron_no_bn(x, w, b, *, key=None, p=0.5, training=True):
    """x: (B, c_in) f32, w: (c_out, c_in) f32, b: (c_out,) f32 -> (B, c_out)."""
    B, c_in = x.shape
    c_out, c_in_w = w.shape
    assert c_in == c_in_w
    p = float(p)

    # p >= 1 in training mode drops everything (matches torch: all zeros).
    if training and p >= 1.0:
        return jnp.zeros((B, c_out), dtype=x.dtype)

    apply_dropout = bool(training) and p > 0.0

    # Tile sizes: lane-dense (multiples of 128) on c_in/c_out, sublane-aligned
    # on B. Sized so double-buffered tiles fit the scoped-VMEM budget on
    # v5e/v6e/v7x (~6 MB at the max tile sizes, well under 16/32 MiB).
    tm = 256 if B >= 256 else _round_up(B, 8)
    tn = 512 if c_out >= 512 else _round_up(c_out, 128)
    tk = 512 if c_in >= 512 else _round_up(c_in, 128)
    Mp = _round_up(B, tm)
    Np = _round_up(c_out, tn)
    Kp = _round_up(c_in, tk)

    # Zero-pad to tile multiples (zero rows/cols contribute nothing to the
    # matmul; padded outputs are sliced away below).
    x_p = jnp.pad(x, ((0, Mp - B), (0, Kp - c_in)))
    w_p = jnp.pad(w, ((0, Np - c_out), (0, Kp - c_in)))
    b_p = jnp.pad(b, (0, Np - c_out)).reshape(1, Np)

    grid = (Mp // tm, Np // tn, Kp // tk)

    in_specs = [
        pl.BlockSpec((tm, tk), lambda i, j, k: (i, k)),   # x tile
        pl.BlockSpec((tn, tk), lambda i, j, k: (j, k)),   # W tile (c_out, c_in)
        pl.BlockSpec((1, tn), lambda i, j, k: (0, j)),    # bias tile
    ]
    inputs = [x_p, w_p, b_p]

    if apply_dropout:
        if key is None:
            key = jax.random.PRNGKey(0)
        # Whole-output uint32 random field: every tile gets independent bits,
        # so there is no cross-tile mask correlation.
        rand = jax.random.bits(key, (Mp, Np), dtype=jnp.uint32)
        in_specs.append(pl.BlockSpec((tm, tn), lambda i, j, k: (i, j)))
        inputs.append(rand)

    flops = 2 * Mp * Kp * Np
    bytes_accessed = 4 * (Mp * Kp + Np * Kp + Np + Mp * Np)
    if apply_dropout:
        bytes_accessed += 4 * Mp * Np

    kernel = partial(perceptron_kernel, p=p, apply_dropout=apply_dropout)

    out = pl.pallas_call(
        kernel,
        out_shape=jax.ShapeDtypeStruct((Mp, Np), x.dtype),
        grid=grid,
        in_specs=in_specs,
        out_specs=pl.BlockSpec((tm, tn), lambda i, j, k: (i, j)),
        scratch_shapes=[pltpu.VMEM((tm, tn), jnp.float32)],
        compiler_params=pltpu.CompilerParams(
            dimension_semantics=("parallel", "parallel", "arbitrary"),
            vmem_limit_bytes=48 * 1024 * 1024),
        cost_estimate=pl.CostEstimate(
            flops=flops, transcendentals=0, bytes_accessed=bytes_accessed),
    )(*inputs)

    return out[:B, :c_out]


if __name__ == "__main__":
    # Small, module-consistent shapes: batch=8, c_in=32, c_out=64.
    B, C_IN, C_OUT = 8, 32, 64

    key = jax.random.PRNGKey(0)
    kx, kw, kb, kd = jax.random.split(key, 4)

    x = jax.random.normal(kx, (B, C_IN), dtype=jnp.float32)

    # PyTorch-style Linear init: U(-1/sqrt(c_in), 1/sqrt(c_in)).
    bound = 1.0 / (C_IN ** 0.5)
    w = jax.random.uniform(kw, (C_OUT, C_IN), minval=-bound, maxval=bound,
                           dtype=jnp.float32)
    b = jax.random.uniform(kb, (C_OUT,), minval=-bound, maxval=bound,
                           dtype=jnp.float32)

    # Training mode (dropout active).
    out_train = jax.block_until_ready(
        perceptron_no_bn(x, w, b, key=kd, p=0.5, training=True))
    assert out_train.shape == (B, C_OUT)
    assert out_train.dtype == jnp.float32
    assert bool(jnp.all(out_train >= 0.0))

    # Eval mode must match the pure-JAX Linear+ReLU reference exactly.
    out_eval = jax.block_until_ready(
        perceptron_no_bn(x, w, b, p=0.5, training=False))
    ref_eval = jnp.maximum(x @ w.T + b, 0.0)
    assert bool(jnp.allclose(out_eval, ref_eval, atol=1e-5, rtol=1e-5))

    # Every kept (nonzero) training activation must equal relu(linear)/(1-p).
    recon = jnp.where(out_train > 0.0, out_train * 0.5, ref_eval)
    assert bool(jnp.allclose(recon, ref_eval, atol=1e-4, rtol=1e-4))

    print("KERNEL_OK")
</pallas_src>

<mosaic_0001>
module attributes {stable_mosaic.version = 11 : i64} {
  func.func @perceptron_kernel(%arg0: i32, %arg1: i32, %arg2: i32, %arg3: memref<8x128xf32, #tpu.memory_space<vmem>>, %arg4: memref<128x128xf32, #tpu.memory_space<vmem>>, %arg5: memref<1x128xf32, #tpu.memory_space<vmem>>, %arg6: memref<8x128xi32, #tpu.memory_space<vmem>>, %arg7: memref<8x128xf32, #tpu.memory_space<vmem>>, %arg8: memref<8x128xf32, #tpu.memory_space<vmem>>) attributes {dimension_semantics = [#tpu.dimension_semantics<parallel>, #tpu.dimension_semantics<parallel>, #tpu.dimension_semantics<arbitrary>], iteration_bounds = array<i64: 1, 1, 1>, scalar_prefetch = 0 : i64, scratch_operands = 1 : i64, tpu.core_type = #tpu.core_type<tc>, window_params = [{transform_indices = @transform_0, window_bounds = array<i64: 8, 128>}, {transform_indices = @transform_1, window_bounds = array<i64: 128, 128>}, {transform_indices = @transform_2, window_bounds = array<i64: 1, 128>}, {transform_indices = @transform_3, window_bounds = array<i64: 8, 128>}, {transform_indices = @transform_4, window_bounds = array<i64: 8, 128>}]} {
    %c0_i32 = arith.constant 0 : i32
    %0 = arith.cmpi eq, %arg2, %c0_i32 : i32
    %1 = arith.extui %0 : i1 to i32
    %c0_i32_0 = arith.constant 0 : i32
    %2 = arith.cmpi ne, %1, %c0_i32_0 : i32
    scf.if %2 {
      %cst_10 = arith.constant 0.000000e+00 : f32
      %12 = vector.broadcast %cst_10 : f32 to vector<8x128xf32>
      %c0_11 = arith.constant 0 : index
      %c0_12 = arith.constant 0 : index
      %13 = vector.load %arg8[%c0_11, %c0_12] : memref<8x128xf32, #tpu.memory_space<vmem>>, vector<8x128xf32>
      tpu.vector_store %arg8[%c0_11, %c0_12], %12 {strides = array<i32>} : memref<8x128xf32, #tpu.memory_space<vmem>>, vector<8x128xf32>,
    } else {
    }
    %c0 = arith.constant 0 : index
    %c0_1 = arith.constant 0 : index
    %3 = vector.load %arg8[%c0, %c0_1] : memref<8x128xf32, #tpu.memory_space<vmem>>, vector<8x128xf32>
    %c0_2 = arith.constant 0 : index
    %c0_3 = arith.constant 0 : index
    %4 = vector.load %arg3[%c0_2, %c0_3] : memref<8x128xf32, #tpu.memory_space<vmem>>, vector<8x128xf32>
    %c0_4 = arith.constant 0 : index
    %c0_5 = arith.constant 0 : index
    %5 = vector.load %arg4[%c0_4, %c0_5] : memref<128x128xf32, #tpu.memory_space<vmem>>, vector<128x128xf32>
    %cst = arith.constant dense<0.000000e+00> : vector<8x128xf32>
    %6 = tpu.matmul %4, %5, %cst {dimension_numbers = #tpu.dot_dimension_numbers<[1], [1], [0], [0], [0, 0, 1, 0], [], []>} : vector<8x128xf32>, vector<128x128xf32>, vector<8x128xf32> -> vector<8x128xf32>
    %7 = arith.addf %3, %6 : vector<8x128xf32>
    %c0_6 = arith.constant 0 : index
    %c0_7 = arith.constant 0 : index
    %8 = vector.load %arg8[%c0_6, %c0_7] : memref<8x128xf32, #tpu.memory_space<vmem>>, vector<8x128xf32>
    tpu.vector_store %arg8[%c0_6, %c0_7], %7 {strides = array<i32>} : memref<8x128xf32, #tpu.memory_space<vmem>>, vector<8x128xf32>,
    %c0_i32_8 = arith.constant 0 : i32
    %9 = arith.cmpi eq, %arg2, %c0_i32_8 : i32
    %10 = arith.extui %9 : i1 to i32
    %c0_i32_9 = arith.constant 0 : i32
    %11 = arith.cmpi ne, %10, %c0_i32_9 : i32
    scf.if %11 {
      %c0_10 = arith.constant 0 : index
      %c0_11 = arith.constant 0 : index
      %12 = vector.load %arg8[%c0_10, %c0_11] : memref<8x128xf32, #tpu.memory_space<vmem>>, vector<8x128xf32>
      %c0_12 = arith.constant 0 : index
      %c0_13 = arith.constant 0 : index
      %13 = vector.load %arg5[%c0_12, %c0_13] : memref<1x128xf32, #tpu.memory_space<vmem>>, vector<1x128xf32>
      %14 = vector.broadcast %13 : vector<1x128xf32> to vector<8x128xf32>
      %15 = arith.addf %12, %14 : vector<8x128xf32>
      %c0_14 = arith.constant 0 : index
      %c0_15 = arith.constant 0 : index
      %16 = vector.load %arg6[%c0_14, %c0_15] : memref<8x128xi32, #tpu.memory_space<vmem>>, vector<8x128xi32>
      %c-2147483648_i32 = arith.constant -2147483648 : i32
      %17 = vector.broadcast %c-2147483648_i32 : i32 to vector<8x128xi32>
      %18 = arith.cmpi uge, %16, %17 : vector<8x128xi32>
      %cst_16 = arith.constant 0.000000e+00 : f32
      %19 = vector.broadcast %cst_16 : f32 to vector<8x128xf32>
      %20 = arith.cmpf ogt, %15, %19 : vector<8x128xf32>
      %21 = arith.andi %18, %20 : vector<8x128xi1>
      %cst_17 = arith.constant 2.000000e+00 : f32
      %22 = vector.broadcast %cst_17 : f32 to vector<8x128xf32>
      %23 = arith.mulf %15, %22 : vector<8x128xf32>
      %cst_18 = arith.constant 0.000000e+00 : f32
      %24 = vector.broadcast %cst_18 : f32 to vector<8x128xf32>
      %25 = arith.select %21, %23, %24 : vector<8x128xi1>, vector<8x128xf32>
      %c0_19 = arith.constant 0 : index
      %c0_20 = arith.constant 0 : index
      %26 = vector.load %arg7[%c0_19, %c0_20] : memref<8x128xf32, #tpu.memory_space<vmem>>, vector<8x128xf32>
      tpu.vector_store %arg7[%c0_19, %c0_20], %25 {strides = array<i32>} : memref<8x128xf32, #tpu.memory_space<vmem>>, vector<8x128xf32>,
    } else {
    }
    return
  }
  func.func @transform_0(%arg0: i32, %arg1: i32, %arg2: i32) -> (i32, i32) {
    %c0_i32 = arith.constant 0 : i32
    return %arg0, %arg2 : i32, i32
  }
  func.func @transform_1(%arg0: i32, %arg1: i32, %arg2: i32) -> (i32, i32) {
    %c0_i32 = arith.constant 0 : i32
    return %arg1, %arg2 : i32, i32
  }
  func.func @transform_2(%arg0: i32, %arg1: i32, %arg2: i32) -> (i32, i32) {
    %c0_i32 = arith.constant 0 : i32
    %c0_i32_0 = arith.constant 0 : i32
    return %c0_i32, %arg1 : i32, i32
  }
  func.func @transform_3(%arg0: i32, %arg1: i32, %arg2: i32) -> (i32, i32) {
    %c0_i32 = arith.constant 0 : i32
    return %arg0, %arg1 : i32, i32
  }
  func.func @transform_4(%arg0: i32, %arg1: i32, %arg2: i32) -> (i32, i32) {
    %c0_i32 = arith.constant 0 : i32
    return %arg0, %arg1 : i32, i32
  }
}

</mosaic_0001>

<bundles_post_ra>
// kernel: tpu_custom_call.1
= control target key start
LH: loop header
LB: loop body
LE: loop exit
PB: predicated region body
PF: predicated region fallthrough
CT: control target
= control target key end

     0   :  { %9 = vsyncpa [#allocation4], 0  ;;  %s413_s0 = inlined_call_operand.hbm [shape: f32[8,128], index: 0, kind: input, shape index: {}]   ;;  %s414_s1 = inlined_call_operand.hbm [shape: f32[128,128], index: 1, kind: input, shape index: {}]   ;;  %s415_s2 = inlined_call_operand.vmem [shape: f32[1,128], index: 2, kind: input, shape index: {}]   ;;  %s416_s3 = inlined_call_operand.vmem [shape: u32[8,128], index: 3, kind: input, shape index: {}]   ;;  %s417_s4 = inlined_call_operand.hbm [shape: f32[8,128], index: 4, kind: output, shape index: {}]  }
   0x1   :  { %10 = vsyncpa [#allocation7], 0 }
   0x2   :  { %11 = vsyncpa [#allocation5], 0  ;;  %s331_s15 = smov [#allocation3]   ;;  %s332_s17 = smov [#allocation6]  }
   0x3   :  { %s18_s16 = sshll.u32 %s331_s15, 4  ;;  %s27_s18 = sshll.u32 %s332_s17, 4  ;;  %s19_s16 = int_to_ptr.vmem [resolvable:$true] %s18_s16  ;;  %s364_s18 = int_to_ptr.vmem [resolvable:$true] %s27_s18 }
   0x4   :  { %s259_s21 = scalar_lea.hbm %s413_s0, 128 }
   0x5   :  { %p260_p0 = scmp.ne.s32.totalorder %s413_s0, %s259_s21  ;;  %p263_p1 = scmp.lt.u32.totalorder %s259_s21, %s413_s0 }
   0x7   :  { %p265_p2 = pnand %p263_p1, %p260_p0 }
   0x9   :  { %268 = shalt.err (!%p265_p2)
}
   0xa   :  { %s269_s26 = scalar_lea.vmem %s19_s16, 128  ;;  %p274_p4 = scmp.lt.s32.totalorder %s19_s16, %s19_s16 }
   0xb   :  { %p270_p3 = scmp.ne.s32.totalorder %s19_s16, %s269_s26  ;;  %p275_p5 = scmp.lt.s32.totalorder %s269_s26, %s269_s26 }
   0xd   :  { %p276_p6 = por %p275_p5, %p274_p4 }
   0xf   :  { %p277_p7 = pnand %p276_p6, %p270_p3 }
  0x11   :  { %280 = shalt.err (!%p277_p7)
}
  0x12   :  { %21 = dma.hbm_to_vmem [thread:$0]  %s413_s0, 128, %s19_s16, [#allocation4]  }
  0x13   :  { %s281_s5 = scalar_lea.hbm %s414_s1, 2048 }
  0x14   :  { %p282_p8 = scmp.ne.s32.totalorder %s414_s1, %s281_s5  ;;  %p285_p9 = scmp.lt.u32.totalorder %s281_s5, %s414_s1 }
  0x16   :  { %p287_p10 = pnand %p285_p9, %p282_p8 }
  0x18   :  { %290 = shalt.err (!%p287_p10)
}
  0x19   :  { %s291_s10 = scalar_lea.vmem %s364_s18, 2048  ;;  %p296_p12 = scmp.lt.s32.totalorder %s364_s18, %s364_s18 }
  0x1a   :  { %p292_p11 = scmp.ne.s32.totalorder %s364_s18, %s291_s10  ;;  %p297_p13 = scmp.lt.s32.totalorder %s291_s10, %s291_s10 }
  0x1c   :  { %p298_p0 = por %p297_p13, %p296_p12 }
  0x1e   :  { %p299_p1 = pnand %p298_p0, %p292_p11 }
  0x20   :  { %302 = shalt.err (!%p299_p1)
}
  0x21   :  { %s333_s0 = smov 128   ;;  %s334_s11 = smov 8  }
  0x22   :  { %33 = dma.hbm_to_vmem [thread:$0]  %s414_s1, 2048, %s364_s18, [#allocation7], %s333_s0, %s333_s0, %s334_s11  }
  0x23   :  { %325 = dma.done.wait [#allocation4], 128  }
  0x24   :  { %326 = vsyncadd [#allocation4], 4294967168 }
  0x25   :  { %327 = dma.done.wait [#allocation7], 2048  }
  0x26   :  { %328 = vsyncadd [#allocation7], 4294965248  ;;  %v335_v0 = vmov 0.0|0.0   ;;  %vm336_vm0 = vmmov 0   ;;  %v337_v1 = vmov 0.0   ;;  %v51_v2 = vld [vmem:[#allocation6] sm:$0xff] }
  0x27   :  { %227 = vmatprep.subr.bf16.mxu0 %v335_v0  ;;  %224 = vmatprep.mubr.msk.f32.mxu0 %vm336_vm0, %v337_v1  ;;  %v52_v3 = vld [vmem:[#allocation6 + $0x8] sm:$0xff]  ;;  %v53_v5 = vld [vmem:[#allocation6 + $0x10] sm:$0xff]  ;;  %v54_v6 = vld [vmem:[#allocation6 + $0x18] sm:$0xff]  ;;  %s338_s17 = smov [#allocation8]  }
  0x28   :  { %v228_v4 = vpack.c.bf16 %v52_v3, %v51_v2  ;;  %v231_v7 = vpack.c.bf16 %v54_v6, %v53_v5  ;;  %v55_v8 = vld [vmem:[#allocation6 + $0x20] sm:$0xff]  ;;  %v56_v9 = vld [vmem:[#allocation6 + $0x28] sm:$0xff]  ;;  %v57_v11 = vld [vmem:[#allocation6 + $0x30] sm:$0xff]  ;;  %s164_s18 = sshll.u32 %s338_s17, 4  ;;  %s165_s18 = int_to_ptr.vmem [resolvable:$true] %s164_s18 }
  0x29   :  { %v234_v10 = vpack.c.bf16 %v56_v9, %v55_v8  ;;  %v58_v12 = vld [vmem:[#allocation6 + $0x38] sm:$0xff]  ;;  %v59_v14 = vld [vmem:[#allocation6 + $0x40] sm:$0xff]  ;;  %v60_v15 = vld [vmem:[#allocation6 + $0x48] sm:$0xff]  ;;  %s303_s19 = scalar_lea.vmem %s165_s18, 128  ;;  %p308_p3 = scmp.lt.s32.totalorder %s165_s18, %s165_s18 }
  0x2a   :  { %229 = vmatpush3.bf16.xpose.msra.mxu0 %v228_v4  ;;  %v237_v13 = vpack.c.bf16 %v58_v12, %v57_v11  ;;  %v240_v16 = vpack.c.bf16 %v60_v15, %v59_v14  ;;  %v61_v17 = vld [vmem:[#allocation6 + $0x50] sm:$0xff]  ;;  %v62_v18 = vld [vmem:[#allocation6 + $0x58] sm:$0xff]  ;;  %v63_v20 = vld [vmem:[#allocation6 + $0x60] sm:$0xff]  ;;  %p304_p2 = scmp.ne.s32.totalorder %s165_s18, %s303_s19  ;;  %p309_p4 = scmp.lt.s32.totalorder %s303_s19, %s303_s19 }
  0x2b   :  { %230 = vmatprep.subr.bf16.mxu0 %v335_v0  ;;  %v243_v19 = vpack.c.bf16 %v62_v18, %v61_v17  ;;  %v64_v21 = vld [vmem:[#allocation6 + $0x68] sm:$0xff]  ;;  %v65_v23 = vld [vmem:[#allocation6 + $0x70] sm:$0xff]  ;;  %v66_v24 = vld [vmem:[#allocation6 + $0x78] sm:$0xff] }
  0x2c   :  { %v246_v22 = vpack.c.bf16 %v64_v21, %v63_v20  ;;  %v249_v25 = vpack.c.bf16 %v66_v24, %v65_v23  ;;  %v50_v26 = vld [vmem:[#allocation3] sm:$0xff]  ;;  %p310_p5 = por %p309_p4, %p308_p3 }
  0x2d   :  { %v174_v27 = vld [vmem:[%s415_s2] ss:$0 sm:$0xff] }
  0x2e   :  { %v151_v28 = vld [vmem:[%s416_s3] sm:$0xff]  ;;  %p311_p6 = pnand %p310_p5, %p304_p2 }
  0x2f   :  { %vm152_vm1 = vcmp.ge.u32.totalorder %v151_v28, 2147483648 }
  0x32   :  { %232 = vmatpush3.bf16.xpose.msra.mxu0 %v231_v7 }
  0x33   :  { %233 = vmatprep.subr.bf16.mxu0 %v335_v0 }
  0x3a   :  { %235 = vmatpush3.bf16.xpose.msra.mxu0 %v234_v10 }
  0x3b   :  { %236 = vmatprep.subr.bf16.mxu0 %v335_v0 }
  0x42   :  { %238 = vmatpush3.bf16.xpose.msra.mxu0 %v237_v13 }
  0x43   :  { %239 = vmatprep.subr.bf16.mxu0 %v335_v0 }
  0x4a   :  { %241 = vmatpush3.bf16.xpose.msra.mxu0 %v240_v16 }
  0x4b   :  { %242 = vmatprep.subr.bf16.mxu0 %v335_v0 }
  0x52   :  { %244 = vmatpush3.bf16.xpose.msra.mxu0 %v243_v19 }
  0x53   :  { %245 = vmatprep.subr.bf16.mxu0 %v335_v0 }
  0x5a   :  { %247 = vmatpush3.bf16.xpose.msra.mxu0 %v246_v22 }
  0x5b   :  { %248 = vmatprep.subr.bf16.mxu0 %v335_v0 }
  0x62   :  { %250 = vmatpush3.bf16.xpose.msra.mxu0 %v249_v25 }
  0x69   :  { %225 = vmatmul.mubr.f32.vlgmr.msra.gmra.mrb[0].mxu0 %v50_v26 }
 0x13c   :  { %v133_v29 = vpop.f32.mrb[0].mxu0 }
 0x13d   :  { %v150_v30 = vadd.f32 %v174_v27, %v133_v29  ;;  %v226_v31 = vpop.f32.mrb[1].mxu0 }
 0x13f   :  { %vm153_vm2 = vcmp.gt.f32.partialorder %v150_v30, 0.0  ;;  %v155_v32 = vmul.f32 2.0, %v150_v30 }
 0x140   :  { %vm154_vm3 = vmand %vm152_vm1, %vm153_vm2 }
 0x141   :  { %v156_v33 = vsel %vm154_vm3, %v155_v32, 0.0 }
 0x142   :  { %157 = vst [vmem:[#allocation8] sm:$0xff] %v156_v33 }
 0x143   :  { %314 = shalt.err (!%p311_p6)
}
 0x144   :  { %s315_s20 = scalar_lea.hbm %s417_s4, 128 }
 0x145   :  { %p316_p7 = scmp.ne.s32.totalorder %s417_s4, %s315_s20  ;;  %p319_p8 = scmp.lt.u32.totalorder %s315_s20, %s417_s4 }
 0x147   :  { %p321_p9 = pnand %p319_p8, %p316_p7 }
 0x149   :  { %324 = shalt.err (!%p321_p9)
}
 0x14a   :  { %167 = dma.vmem_to_hbm [thread:$0]  %s165_s18, 128, %s417_s4, [#allocation5]  }
 0x14b   :  { %329 = dma.done.wait [#allocation5], 128  }
 0x14c   :  { %330 = vsyncadd [#allocation5], 4294967168 }
 0x14d   :  { %171 = vsyncpa [#allocation4], 1 }
 0x14e   :  { %172 = vsyncpa [#allocation7], 1 }
 0x14f   :  { %173 = vsyncpa [#allocation5], 1 }

</bundles_post_ra>
